<compile_context>
chip_gen: v5e
topology: v5e:2x2
jax: 0.10.0
libtpu: 0.0.40
codegen_flags: <defaults>
</compile_context>

<pallas_src>
import jax
import jax.numpy as jnp
from jax.experimental import pallas as pl
from jax.experimental.pallas import tpu as pltpu


def _round_up(x: int, m: int) -> int:
    return ((x + m - 1) // m) * m


def _vmem_capacity_bytes() -> int:
    """Physical VMEM of the current TPU generation (conservative fallback)."""
    try:
        cap = getattr(pltpu.get_tpu_info(), "vmem_capacity_bytes", None)
        if cap:
            return int(cap)
    except Exception:
        pass
    return 64 * 1024 * 1024  # v7x-sized fallback; safe on every generation


def _per_row_vmem_bytes(c: int, dtype) -> int:
    """Approximate VMEM bytes consumed per batch row of one tile."""
    itemsize = jnp.dtype(dtype).itemsize
    logits_rows = 2 * c * itemsize      # native-dtype logits tile, double-buffered
    f32_temps = 5 * c * 4               # f32 upcast, shifted, exp, col iota, select
    targets_rows = 2 * 128 * 4          # (tile_n, 1) int32 lane-padded to 128, x2 bufs
    return logits_rows + f32_temps + targets_rows


def _auto_tile_n(c: int, dtype, vmem_cap: int) -> int:
    budget = int(vmem_cap * 0.55)       # headroom under the scoped VMEM limit
    tile_n = budget // max(_per_row_vmem_bytes(c, dtype), 1)
    return max(8, min(8192, int(tile_n)))


def _make_ce_partial_kernel(n_total: int, tile_n: int):
    has_remainder = (n_total % tile_n) != 0

    def kernel(logits_ref, targets_ref, out_ref):
        # logits_ref : (tile_n, C) input dtype, VMEM
        # targets_ref: (tile_n, 1) int32, VMEM
        # out_ref    : (8, 128) f32 partial-sum block for THIS tile
        i = pl.program_id(0)
        x = logits_ref[...]                                     # (tile_n, C) native dtype
        tgt = targets_ref[...]                                  # (tile_n, 1) int32
        tn, c = x.shape

        # Target-logit gather on the native-dtype tile (bf16 packs 2 elems/lane on the
        # VPU); each row is zeros + one value so the sum is exact, accumulated in f32.
        col = jax.lax.broadcasted_iota(jnp.int32, (tn, c), 1)
        tgt_logit = jnp.sum(
            jnp.where(col == tgt, x, jnp.zeros((), x.dtype)),
            axis=-1, keepdims=True, dtype=jnp.float32)          # (tile_n, 1)

        # Numerically-stable log-sum-exp over the class (lane) axis in f32.
        xf = x.astype(jnp.float32)
        m = jnp.max(xf, axis=-1, keepdims=True)                 # (tile_n, 1)
        lse = m + jnp.log(jnp.sum(jnp.exp(xf - m), axis=-1, keepdims=True))
        per_sample = lse - tgt_logit                            # CE(reduction='none')

        def write(vals):
            out_ref[...] = jnp.broadcast_to(
                jnp.sum(vals).astype(jnp.float32), (8, 128))

        if has_remainder:
            last = pl.num_programs(0) - 1

            @pl.when(i != last)
            def _full_tile():
                write(per_sample)

            @pl.when(i == last)
            def _masked_tile():
                # Padded OOB rows of the last tile may hold garbage -> zero them.
                row = jax.lax.broadcasted_iota(jnp.int32, (tn, 1), 0) + i * tile_n
                write(jnp.where(row < n_total, per_sample, 0.0))
        else:
            write(per_sample)

    return kernel


def ce_loss_with_index(indices, logits, targets, *, tile_n=None):
    """Matches CELossWithIndex.forward; `indices` is accepted but unused."""
    del indices  # unused by the loss, same as the reference module

    n, c = logits.shape
    vmem_cap = _vmem_capacity_bytes()

    # Tile over N: multiple of 8 sublanes, sized against the generation's VMEM
    # (including f32 temporaries and the lane-padded targets block), up to 8192 rows.
    if tile_n is None:
        tile_n = _auto_tile_n(c, logits.dtype, vmem_cap)
    tile_n = max(8, (int(tile_n) // 8) * 8)
    tile_n = min(tile_n, _round_up(n, 8))

    num_tiles = pl.cdiv(n, tile_n)

    # Targets as (N, 1) int32 so the class compare broadcasts along the lane axis.
    targets_2d = targets.astype(jnp.int32).reshape(n, 1)

    kernel = _make_ce_partial_kernel(n, tile_n)

    # One aligned (8,128) f32 partial-sum block per tile; reduced in JAX below.
    partials = pl.pallas_call(
        kernel,
        out_shape=jax.ShapeDtypeStruct((num_tiles * 8, 128), jnp.float32),
        grid=(num_tiles,),
        in_specs=[
            pl.BlockSpec((tile_n, c), lambda i: (i, 0)),   # logits tile (native dtype)
            pl.BlockSpec((tile_n, 1), lambda i: (i, 0)),   # targets tile
        ],
        out_specs=pl.BlockSpec((8, 128), lambda i: (i, 0)),
        compiler_params=pltpu.CompilerParams(
            dimension_semantics=("parallel",),             # megacore-shardable on v7x
            vmem_limit_bytes=int(vmem_cap * 7 // 8),       # generation-aware scoped limit
        ),
    )(logits, targets_2d)

    per_tile = partials[::8, 0]                            # one copy of each tile's sum
    return jnp.sum(per_tile) / jnp.float32(n)              # .mean()


if __name__ == "__main__":
    key = jax.random.PRNGKey(0)
    k_idx, k_logits, k_tgt = jax.random.split(key, 3)

    # Small shapes; N chosen so the explicit tile_n=16 exercises the remainder mask.
    N, C = 40, 128
    indices = jax.random.randint(k_idx, (N,), 0, 1000, dtype=jnp.int32)
    logits = jax.random.normal(k_logits, (N, C), dtype=jnp.float32)
    targets = jax.random.randint(k_tgt, (N,), 0, C, dtype=jnp.int32)

    # f32 path: explicit small tile -> multi-tile "parallel" grid with a masked
    # remainder tile and per-tile partials reduced in JAX.
    loss = ce_loss_with_index(indices, logits, targets, tile_n=16)
    jax.block_until_ready(loss)

    lse = jax.scipy.special.logsumexp(logits, axis=-1)
    ref = jnp.mean(lse - logits[jnp.arange(N), targets])
    assert jnp.allclose(loss, ref, atol=2e-5, rtol=1e-5), (loss, ref)

    # bf16 path: auto tile sizing, no wrapper pre-cast; target gather on the native
    # bf16 tile, logsumexp in f32 inside the kernel.
    logits_bf16 = logits.astype(jnp.bfloat16)
    loss_bf16 = ce_loss_with_index(indices, logits_bf16, targets)
    jax.block_until_ready(loss_bf16)

    logits_b32 = logits_bf16.astype(jnp.float32)
    lse_b = jax.scipy.special.logsumexp(logits_b32, axis=-1)
    ref_b = jnp.mean(lse_b - logits_b32[jnp.arange(N), targets])
    assert jnp.allclose(loss_bf16, ref_b, atol=1e-4, rtol=1e-4), (loss_bf16, ref_b)

    print("KERNEL_OK")
</pallas_src>

<mosaic_0001>
module attributes {stable_mosaic.version = 11 : i64} {
  func.func @kernel(%arg0: i32, %arg1: memref<16x128xf32, #tpu.memory_space<vmem>>, %arg2: memref<16x1xi32, #tpu.memory_space<vmem>>, %arg3: memref<8x128xf32, #tpu.memory_space<vmem>>) attributes {dimension_semantics = [#tpu.dimension_semantics<parallel>], iteration_bounds = array<i64: 3>, scalar_prefetch = 0 : i64, scratch_operands = 0 : i64, tpu.core_type = #tpu.core_type<tc>, window_params = [{transform_indices = @transform_0, window_bounds = array<i64: 16, 128>}, {transform_indices = @transform_1, window_bounds = array<i64: 16, 1>}, {transform_indices = @transform_2, window_bounds = array<i64: 8, 128>}]} {
    %c0 = arith.constant 0 : index
    %c0_0 = arith.constant 0 : index
    %0 = vector.load %arg1[%c0, %c0_0] : memref<16x128xf32, #tpu.memory_space<vmem>>, vector<16x128xf32>
    %c0_1 = arith.constant 0 : index
    %c0_2 = arith.constant 0 : index
    %1 = vector.load %arg2[%c0_1, %c0_2] : memref<16x1xi32, #tpu.memory_space<vmem>>, vector<16x1xi32>
    %2 = tpu.iota {dimensions = array<i32: 1>} : vector<16x128xi32>
    %3 = vector.broadcast %1 : vector<16x1xi32> to vector<16x128xi32>
    %4 = arith.cmpi eq, %2, %3 : vector<16x128xi32>
    %cst = arith.constant 0.000000e+00 : f32
    %5 = vector.broadcast %cst : f32 to vector<16x128xf32>
    %6 = arith.select %4, %0, %5 : vector<16x128xi1>, vector<16x128xf32>
    %cst_3 = arith.constant dense<0.000000e+00> : vector<16xf32>
    %7 = vector.multi_reduction <add>, %6, %cst_3 [1] : vector<16x128xf32> to vector<16xf32>
    %8 = vector.shape_cast %7 : vector<16xf32> to vector<16x1xf32>
    %cst_4 = arith.constant dense<0xFF800000> : vector<16xf32>
    %9 = vector.multi_reduction <maximumf>, %0, %cst_4 [1] : vector<16x128xf32> to vector<16xf32>
    %10 = vector.shape_cast %9 : vector<16xf32> to vector<16x1xf32>
    %11 = vector.broadcast %10 : vector<16x1xf32> to vector<16x128xf32>
    %12 = arith.subf %0, %11 : vector<16x128xf32>
    %13 = math.exp %12 : vector<16x128xf32>
    %cst_5 = arith.constant dense<0.000000e+00> : vector<16xf32>
    %14 = vector.multi_reduction <add>, %13, %cst_5 [1] : vector<16x128xf32> to vector<16xf32>
    %15 = vector.shape_cast %14 : vector<16xf32> to vector<16x1xf32>
    %16 = math.log %15 : vector<16x1xf32>
    %17 = arith.addf %10, %16 : vector<16x1xf32>
    %18 = arith.subf %17, %8 : vector<16x1xf32>
    %c2_i32 = arith.constant 2 : i32
    %19 = arith.cmpi ne, %arg0, %c2_i32 : i32
    %20 = arith.extui %19 : i1 to i32
    %c0_i32 = arith.constant 0 : i32
    %21 = arith.cmpi ne, %20, %c0_i32 : i32
    scf.if %21 {
      %25 = vector.shape_cast %18 : vector<16x1xf32> to vector<1x16x1xf32>
      %cst_8 = arith.constant dense<0.000000e+00> : vector<1xf32>
      %26 = vector.multi_reduction <add>, %25, %cst_8 [1, 2] : vector<1x16x1xf32> to vector<1xf32>
      %27 = vector.shape_cast %26 : vector<1xf32> to vector<1x1x1xf32>
      %28 = vector.extract %27[0, 0, 0] : f32 from vector<1x1x1xf32>
      %29 = vector.broadcast %28 : f32 to vector<8x128xf32>
      %c0_9 = arith.constant 0 : index
      %c0_10 = arith.constant 0 : index
      %30 = vector.load %arg3[%c0_9, %c0_10] : memref<8x128xf32, #tpu.memory_space<vmem>>, vector<8x128xf32>
      tpu.vector_store %arg3[%c0_9, %c0_10], %29 {strides = array<i32>} : memref<8x128xf32, #tpu.memory_space<vmem>>, vector<8x128xf32>,
    } else {
    }
    %c2_i32_6 = arith.constant 2 : i32
    %22 = arith.cmpi eq, %arg0, %c2_i32_6 : i32
    %23 = arith.extui %22 : i1 to i32
    %c0_i32_7 = arith.constant 0 : i32
    %24 = arith.cmpi ne, %23, %c0_i32_7 : i32
    scf.if %24 {
      %25 = tpu.iota {dimensions = array<i32: 0>} : vector<16x1xi32>
      %c16_i32 = arith.constant 16 : i32
      %26 = arith.muli %arg0, %c16_i32 : i32
      %27 = vector.broadcast %26 : i32 to vector<16x1xi32>
      %28 = arith.addi %25, %27 : vector<16x1xi32>
      %c40_i32 = arith.constant 40 : i32
      %29 = vector.broadcast %c40_i32 : i32 to vector<16x1xi32>
      %30 = arith.cmpi slt, %28, %29 : vector<16x1xi32>
      %cst_8 = arith.constant 0.000000e+00 : f32
      %31 = vector.broadcast %cst_8 : f32 to vector<16x1xf32>
      %32 = arith.select %30, %18, %31 : vector<16x1xi1>, vector<16x1xf32>
      %33 = vector.shape_cast %32 : vector<16x1xf32> to vector<1x16x1xf32>
      %cst_9 = arith.constant dense<0.000000e+00> : vector<1xf32>
      %34 = vector.multi_reduction <add>, %33, %cst_9 [1, 2] : vector<1x16x1xf32> to vector<1xf32>
      %35 = vector.shape_cast %34 : vector<1xf32> to vector<1x1x1xf32>
      %36 = vector.extract %35[0, 0, 0] : f32 from vector<1x1x1xf32>
      %37 = vector.broadcast %36 : f32 to vector<8x128xf32>
      %c0_10 = arith.constant 0 : index
      %c0_11 = arith.constant 0 : index
      %38 = vector.load %arg3[%c0_10, %c0_11] : memref<8x128xf32, #tpu.memory_space<vmem>>, vector<8x128xf32>
      tpu.vector_store %arg3[%c0_10, %c0_11], %37 {strides = array<i32>} : memref<8x128xf32, #tpu.memory_space<vmem>>, vector<8x128xf32>,
    } else {
    }
    return
  }
  func.func @transform_0(%arg0: i32) -> (i32, i32) {
    %c0_i32 = arith.constant 0 : i32
    %c0_i32_0 = arith.constant 0 : i32
    return %arg0, %c0_i32 : i32, i32
  }
  func.func @transform_1(%arg0: i32) -> (i32, i32) {
    %c0_i32 = arith.constant 0 : i32
    %c0_i32_0 = arith.constant 0 : i32
    return %arg0, %c0_i32 : i32, i32
  }
  func.func @transform_2(%arg0: i32) -> (i32, i32) {
    %c0_i32 = arith.constant 0 : i32
    %c0_i32_0 = arith.constant 0 : i32
    return %arg0, %c0_i32 : i32, i32
  }
}

</mosaic_0001>

<bundles_post_ra>
// kernel: tpu_custom_call.1
= control target key start
LH: loop header
LB: loop body
LE: loop exit
PB: predicated region body
PF: predicated region fallthrough
CT: control target
= control target key end

     0   :  { %7 = vsyncpa [#allocation3], 0  ;;  %s636_s0 = inlined_call_operand.vmem [shape: f32[40,128], index: 0, kind: input, shape index: {}]   ;;  %s637_s1 = inlined_call_operand.vmem [shape: s32[40,1], index: 1, kind: input, shape index: {}]   ;;  %s638_s2 = inlined_call_operand.hbm [shape: f32[24,128], index: 2, kind: output, shape index: {}]  }
   0x1   :  { %9 = vsyncpa [#allocation3 + $0x1], 0  ;;  %s534_s9 = smov 0   ;;  %s536_s10 = smov 0  }
   0x2   :  { %s538_s11 = smov 0   ;;  %s540_s12 = smov 0  }
   0x3 LB: > { %s555_s13 = sadd.s32 4294967295, %s516_s12   ;;  %s384_s14 = sadd.s32 4294967294, %s516_s12   ;;  %s516_s12 = sphi %s540_s12, %s644_s12   ;;  %s512_s11 = sphi %s538_s11, %s643_s11   ;;  %s508_s10 = sphi %s536_s10, %s642_s10   ;;  %s504_s9 = sphi %s534_s9, %s641_s9  }
   0x4   : > { %s559_s15 = sadd.s32 1, %s516_s12   ;;  %s74_s16 = sadd.s32 1, %s512_s11 }
   0x5   : > { %s71_s17 = ssub.s32 %s516_s12, %s559_s15  ;;  %p84_p0 = scmp.ne.s32.totalorder %s512_s11, %s508_s10 }
   0x6   : > { %p72_p1 = scmp.eq.s32.totalorder %s71_s17, 0  ;;  %p85_p2 = scmp.eq.s32.totalorder %s555_s13, 2 }
   0x7   : > { %p90_p3 = scmp.ne.s32.totalorder %s508_s10, %s504_s9  ;;  %p91_p4 = scmp.eq.s32.totalorder %s384_s14, 2 }
   0x8   : > { %s570_s18 = scalar_select %p72_p1, %s512_s11, %s74_s16  }
   0x9   : > { %p574_p5 = por %p85_p2, %p84_p0  ;;  %p578_p6 = por %p91_p4, %p90_p3 }
   0xa   : > { %p387_p7 = scmp.ge.s32.totalorder %s516_s12, 1  ;;  %p143_p8 = scmp.lt.s32.totalorder %s516_s12, 4 }
   0xc   : > { %p144_p9 = pnand %p387_p7, %p143_p8 }
   0xd   : > { %s389_s21 = sshll.u32 (!%p144_p9), %s555_s13, 1  ;;  %s175_s29 = sand.u32 (!%p144_p9), 1, %s508_s10  }
   0xe   : > { %147 = sbr.rel (%p144_p9) target bundleno = 683 (0x2ab), region = 28  ;;  %p183_p10 = scmp.lt.s32.totalorder (!%p144_p9), %s389_s21, 4 }
   0xf   : > { %s388_s30 = sshll.u32 (!%p144_p9), %s175_s29, 3 }
  0x10   : > { %s594_s3 = scalar_lea.vmem (!%p144_p9), [#allocation2], %s388_s30 }
  0x13   : > { %v518_v0 = vmov 0   ;;  %s646_s21 = smov (!%p183_p10, %s389_s21), 4  ;;  %v210_v5 = vlaneseq }
  0x14   : > { %444 = vset.pattern.permute.xlu1 %v518_v0  ;;  %445 = vset.pattern.permute.xlu0 %v518_v0  ;;  %s390_s22 = sshll.u32 %s646_s21, 3 }
  0x15   : > { %s186_s25 = scalar_lea.vmem %s636_s0, %s390_s22  ;;  %s200_s28 = scalar_lea.vmem %s637_s1, %s390_s22  ;;  %v211_v6 = vand.u32 127, %v210_v5 }
  0x16   : > { %v206_v1 = vld [vmem:[%s186_s25] sm:$0xff]  ;;  %v207_v3 = vld [vmem:[%s186_s25 + $0x8] sm:$0xff] }
  0x17   : > { %v208_v2 = vld [vmem:[%s200_s28] sm:$0xff]  ;;  %226 = vmax.xlane.f32.xlu0 %v206_v1  ;;  %v209_v4 = vld [vmem:[%s200_s28 + $0x8] sm:$0xff] }
  0x18   : > { %213 = vperm.xlu1 %444, %v208_v2  }
  0x1f   : > { %228 = vmax.xlane.f32.xlu0 %v207_v3 }
  0x20   : > { %216 = vperm.xlu1 %444, %v209_v4  }
  0x8a   : > { %v214_v7 = vpop.permute.xlu1 %213  ;;  %v227_v8 = vpop.xlane.xlu0 %226 }
  0x8b   : > { %vm218_vm0 = vcmp.eq.s32.totalorder %v211_v6, %v214_v7  ;;  %v230_v9 = vsub.f32 %v206_v1, %v227_v8 }
  0x8c   : > { %v220_v10 = vsel %vm218_vm0, %v206_v1, 0.0 }
  0x8d   : > { %222 = vadd.xlane.f32.xlu0 %v220_v10  ;;  %v232_v11 = vmul.f32 1.442695, %v230_v9 }
  0x8f   : > { %446 = vpow2.f32 %v232_v11 }
  0x92   : > { %v217_v12 = vpop.permute.xlu1 %216  ;;  %v229_v13 = vpop.xlane.xlu0 %228 }
  0x93   : > { %vm219_vm1 = vcmp.eq.s32.totalorder %v211_v6, %v217_v12  ;;  %v231_v14 = vsub.f32 %v207_v3, %v229_v13 }
  0x94   : > { %v221_v15 = vsel %vm219_vm1, %v207_v3, 0.0 }
  0x95   : > { %224 = vadd.xlane.f32.xlu1 %v221_v15  ;;  %v447_v16 = vpop.eup %446  ;;  %v234_v17 = vmul.f32 1.442695, %v231_v14 }
  0x96   : > { %236 = vadd.xlane.f32.xlu2 %v447_v16 }
  0x97   : > { %448 = vpow2.f32 %v234_v17 }
  0x9d   : > { %v449_v18 = vpop.eup %448 }
  0x9e   : > { %238 = vadd.xlane.f32.xlu2 %v449_v18 }
 0x100   : > { %v223_v23 = vpop.xlane.xlu0 %222 }
 0x108   : > { %v225_v29 = vpop.xlane.xlu1 %224 }
 0x109   : > { %v237_v19 = vpop.xlane.xlu2 %236 }
 0x10a   : > { %450 = vlog2.f32 %v237_v19 }
 0x110   : > { %v451_v20 = vpop.eup %450 }
 0x111   : > { %v241_v21 = vmul.f32 0.6931472, %v451_v20  ;;  %v239_v22 = vpop.xlane.xlu2 %238 }
 0x112   : > { %452 = vlog2.f32 %v239_v22 }
 0x113   : > { %v244_v24 = vadd.f32 %v241_v21, %v227_v8 }
 0x115   : > { %v246_v25 = vsub.f32 %v244_v24, %v223_v23 }
 0x118   : > { %v453_v26 = vpop.eup %452 }
 0x119   : > { %v243_v27 = vmul.f32 0.6931472, %v453_v26  ;;  %251 = sbr.rel (%p85_p2) target bundleno = 470 (0x1d6), region = 32 }
 0x11b   : > { %v245_v28 = vadd.f32 %v243_v27, %v229_v13 }
 0x11d   : > { %v247_v30 = vsub.f32 %v245_v28, %v225_v29 }
 0x11e   : > { %vm252_vm2 = vcmask 7168  }
 0x11f   : > { %v253_v31 = vsel %vm252_vm2, %v246_v25, 0.0  ;;  %v254_v32 = vsel %vm252_vm2, %v247_v30, 0.0 }
 0x120   : > { %v255_v33 = vadd.f32 %v254_v32, %v253_v31 }
 0x122   : > { %256 = vadd.xlane.f32.xlu0 %v255_v33 }
 0x195   : > { %v257_v34 = vpop.xlane.xlu0 %256 }
 0x196   : > { %v258_v35 = vrot.slane %v257_v34, 4 }
 0x198   : > { %v259_v36 = vadd.f32 %v258_v35, %v257_v34 }
 0x19a   : > { %v260_v37 = vrot.slane %v259_v36, 2 }
 0x19c   : > { %v261_v38 = vadd.f32 %v260_v37, %v259_v36 }
 0x19e   : > { %v262_v39 = vrot.slane %v261_v38, 1 }
 0x1a0   : > { %v263_v40 = vadd.f32 %v262_v39, %v261_v38 }
 0x1a2   : > { %400 = vpush %v263_v40 }
 0x1d3   : > { %s401_s4 = spop %400 }
 0x1d4   : > { %v265_v41 = vstv %s401_s4 }
 0x1d5   : > { %266 = vst [vmem:[%s594_s3] sm:$0xff] %v265_v41 }
 0x1d6 PF: > { %p394_p11 = scmp.ne.s32.totalorder %s555_s13, 2 }
 0x1d7   : > { %s395_s5 = sshll.u32 (!%p394_p11), %s555_s13, 4 }
 0x1d8   : > { %270 = sbr.rel (%p394_p11) target bundleno = 668 (0x29c), region = 36 }
 0x1dd   : > { %v272_v42 = vshrl.u32 %v210_v5, 7  ;;  %v275_v43 = vstv %s395_s5  ;;  %vm282_vm3 = vcmask 7168  }
 0x1df   : > { %v273_v44 = vadd.s32 8, %v272_v42  ;;  %v276_v45 = vadd.s32 %v275_v43, %v272_v42 }
 0x1e1   : > { %v277_v46 = vadd.s32 %v275_v43, %v273_v44  ;;  %vm278_vm4 = vcmp.lt.s32.totalorder %v276_v45, 40 }
 0x1e2   : > { %v280_v47 = vsel %vm278_vm4, %v246_v25, 0.0 }
 0x1e3   : > { %vm279_vm5 = vcmp.lt.s32.totalorder %v277_v46, 40  ;;  %v283_v48 = vsel %vm282_vm3, %v280_v47, 0.0 }
 0x1e4   : > { %v281_v49 = vsel %vm279_vm5, %v247_v30, 0.0 }
 0x1e5   : > { %v284_v50 = vsel %vm282_vm3, %v281_v49, 0.0 }
 0x1e6   : > { %v285_v51 = vadd.f32 %v284_v50, %v283_v48 }
 0x1e8   : > { %286 = vadd.xlane.f32.xlu0 %v285_v51 }
 0x25b   : > { %v287_v52 = vpop.xlane.xlu0 %286 }
 0x25c   : > { %v288_v53 = vrot.slane %v287_v52, 4 }
 0x25e   : > { %v289_v54 = vadd.f32 %v288_v53, %v287_v52 }
 0x260   : > { %v290_v55 = vrot.slane %v289_v54, 2 }
 0x262   : > { %v291_v56 = vadd.f32 %v290_v55, %v289_v54 }
 0x264   : > { %v292_v57 = vrot.slane %v291_v56, 1 }
 0x266   : > { %v293_v58 = vadd.f32 %v292_v57, %v291_v56 }
 0x268   : > { %402 = vpush %v293_v58 }
 0x299   : > { %s403_s6 = spop %402 }
 0x29a   : > { %v295_v59 = vstv %s403_s6 }
 0x29b   : > { %296 = vst [vmem:[%s594_s3] sm:$0xff] %v295_v59 }
 0x29c PF: > { %s397_s7 = sshll.u32 %s555_s13, 3  ;;  %s310_s17 = sshll.u32 %s594_s3, 4  ;;  %s311_s17 = int_to_ptr.vmem [resolvable:$true] %s310_s17 }
 0x29d   : > { %s308_s16 = scalar_lea.hbm %s638_s2, %s397_s7  ;;  %s298_s22 = scalar_lea.sflag [#allocation3], %s175_s29 }
 0x29e   : > { %s312_s21 = sshll.u32 %s308_s16, 4  ;;  %s474_s13 = scalar_lea.hbm %s638_s2, 24  ;;  %s313_s21 = int_to_ptr.hbm [resolvable:$true] %s312_s21 }
 0x29f   : > { %s468_s23 = sshra.s32 %s313_s21, 4  ;;  %s469_s23 = int_to_ptr.hbm [resolvable:$true] %s468_s23 }
 0x2a0   : > { %s470_s24 = scalar_lea.hbm %s469_s23, 8  ;;  %p475_p1 = scmp.lt.s32.totalorder %s469_s23, %s638_s2 }
 0x2a1   : > { %p471_p12 = scmp.ne.s32.totalorder %s469_s23, %s470_s24  ;;  %p476_p2 = scmp.lt.s32.totalorder %s474_s13, %s470_s24 }
 0x2a3   : > { %p472_p13 = pnand %p471_p12, %p574_p5  ;;  %p477_p3 = por %p476_p2, %p475_p1 }
 0x2a5   : > { %p473_p0 = pneg %p472_p13 }
 0x2a7   : > { %p478_p4 = pnand %p477_p3, %p473_p0 }
 0x2a9   : > { %481 = shalt.err (!%p478_p4)
}
 0x2aa   : > { %404 = dma.vmem_to_hbm [thread:$0]  (%p574_p5), %s311_s17, 128, %s313_s21, %s298_s22  }
 0x2ab PF: > { %p410_p7 = scmp.ge.s32.totalorder %s516_s12, 2  ;;  %s324_s29 = sand.u32 1, %s504_s9  }
 0x2ac   : > { %s325_s30 = scalar_lea.sflag [#allocation3], %s324_s29 }
 0x2ad   : > { %p407_p8 = pnand %p410_p7, %p578_p6 }
 0x2af   : > { %p408_p9 = pneg %p407_p8 }
 0x2b1   : > { %499 = dma.done.wait (%p408_p9), %s325_s30, 128  }
 0x2b2   : > { %501 = vsyncadd (%p408_p9), %s325_s30, 4294967168  ;;  %p12_p10 = scmp.ge.s32.totalorder %s559_s15, 5   ;;  %s641_s9 = smov %s508_s10 }
 0x2b3   : > { %s642_s10 = smov %s512_s11  ;;  %s643_s11 = smov %s570_s18 }
 0x2b4   : > { %s644_s12 = smov %s559_s15  ;;  %14 = sbr.rel (!%p12_p10) target bundleno = 3 (0x3), region = 74 }
 0x2b9   :  { %331 = vsyncpa [#allocation3], 1 }
 0x2ba   :  { %333 = vsyncpa [#allocation3 + $0x1], 1 }

</bundles_post_ra>
